<compile_context>
chip_gen: v7x
topology: tpu7x:2x2x1
jax: 0.10.0
libtpu: 0.0.40
codegen_flags: <defaults>
</compile_context>

<pallas_src>
import numpy as np
import jax
import jax.numpy as jnp
from jax.experimental import pallas as pl
from jax.experimental.pallas import tpu as pltpu


def _interp_matrix(size: int) -> np.ndarray:
    """(2*size, size) bilinear interpolation matrix, scale=2, align_corners=True."""
    out_size = 2 * size
    M = np.zeros((out_size, size), dtype=np.float32)
    if size == 1:
        M[:, 0] = 1.0
        return M
    scale = (size - 1) / (out_size - 1)
    for p in range(out_size):
        src = p * scale
        i0 = int(np.floor(src))
        i1 = min(i0 + 1, size - 1)
        t = src - i0
        M[p, i0] += 1.0 - t
        M[p, i1] += t
    return M


def _shift_masks(H: int, W: int) -> np.ndarray:
    """(9, H*W) {0,1} masks: tap k=(ky*3+kx) is valid where (h+ky-1, w+kx-1) is in-image."""
    m = np.zeros((9, H * W), dtype=np.float32)
    for k in range(9):
        dy, dx = k // 3 - 1, k % 3 - 1
        for h in range(H):
            if not (0 <= h + dy < H):
                continue
            for w in range(W):
                if 0 <= w + dx < W:
                    m[k, h * W + w] = 1.0
    return m


def _make_kernel(H, W, Cin, Cout, num_groups, eps, upsample):
    HW = H * W
    cpg = Cout // num_groups

    def group_mean(per_channel_sum, count):
        # per_channel_sum: (Cout, 1) f32 -> per-channel copy of the group mean.
        if cpg == 1:
            return per_channel_sum * (1.0 / count)
        g = jnp.sum(per_channel_sum.reshape(num_groups, cpg), axis=1, keepdims=True)
        g = jnp.broadcast_to(g, (num_groups, cpg)).reshape(Cout, 1)
        return g * (1.0 / (count * cpg))

    def kernel(*refs):
        if upsample:
            (x_ref, w_ref, m_ref, g_ref, b_ref, lh_ref, lwt_ref, o_ref, p_ref) = refs
        else:
            (x_ref, w_ref, m_ref, g_ref, b_ref, o_ref, p_ref) = refs

        x2 = x_ref[0]                                    # (Cin, HW) bf16, channel-major

        # --- channel-major im2col: patches[k*Cin+ci, h*W+w] = x[ci, h+dy, w+dx] (0 outside)
        #     Static rolls of the flat tile + precomputed border masks, written straight
        #     into the patches scratch (fully overwritten every step; no zeroing needed).
        for k in range(9):
            dy, dx = k // 3 - 1, k % 3 - 1
            s = dy * W + dx
            t = x2 if s == 0 else jnp.roll(x2, -s, axis=1)
            if s != 0:
                t = t * m_ref[k:k + 1, :]                # zero the wrapped / out-of-image taps
            p_ref[k * Cin:(k + 1) * Cin, :] = t

        # --- conv: one MXU matmul, bf16 operands, f32 accumulation -> (Cout, HW)
        acc = jnp.dot(w_ref[...], p_ref[...], preferred_element_type=jnp.float32)

        # --- GroupNorm (f32, two-pass / shifted variance) + ReLU
        mean = group_mean(jnp.sum(acc, axis=1, keepdims=True), HW)      # (Cout, 1)
        d = acc - mean
        var = group_mean(jnp.sum(d * d, axis=1, keepdims=True), HW)     # (Cout, 1)
        inv = jax.lax.rsqrt(var + eps)
        y = jnp.maximum(d * (inv * g_ref[...]) + b_ref[...], 0.0)       # (Cout, HW) f32

        if not upsample:
            o_ref[0] = y                                 # NCHW-flattened, lane-dense store
        else:
            # --- separable bilinear x2 (align_corners=True), bf16 MXU matmuls
            yb = y.astype(jnp.bfloat16).reshape(Cout, H, W)
            lh_b = jnp.broadcast_to(lh_ref[...][None, :, :], (Cout, 2 * H, H))
            r = jax.lax.dot_general(                     # H pass: (Cout, 2H, W)
                lh_b, yb, (((2,), (1,)), ((0,), (0,))),
                preferred_element_type=jnp.bfloat16)
            r2 = r.reshape(Cout * 2 * H, W)              # merge leading dims (layout-free)
            # W pass: (Cout*2H, W) @ (W, 2W) -> (Cout*2H, 2W), already NCHW order.
            o_ref[0] = jnp.dot(r2, lwt_ref[...], preferred_element_type=jnp.float32)

    return kernel


def _block_bytes(shape, dtype):
    s = list(shape)
    s[-1] = -(-s[-1] // 128) * 128
    if len(s) >= 2:
        s[-2] = -(-s[-2] // 16) * 16
    return int(np.prod(s)) * np.dtype(dtype).itemsize


def conv3x3_gn_relu(x_nchw, weight, gamma, beta, *, num_groups=32, eps=1e-5,
                    upsample=False):
    """Forward pass of Conv3x3GNReLU.  x_nchw: (N, Cin, H, W) float32 -> NCHW float32."""
    N, Cin, H, W = x_nchw.shape
    Cout = weight.shape[0]
    assert Cout % num_groups == 0
    HW = H * W

    # Input stays NCHW: metadata reshape + bf16 cast only (conv runs in bf16).
    x = x_nchw.reshape(N, Cin, HW).astype(jnp.bfloat16)

    # (Cout, Cin, 3, 3) -> (Cout, 9*Cin); column = (ky*3+kx)*Cin + ci (matches patches rows).
    wmat = jnp.transpose(weight, (0, 2, 3, 1)).reshape(Cout, 9 * Cin).astype(jnp.bfloat16)

    masks = jnp.asarray(_shift_masks(H, W), dtype=jnp.bfloat16)        # (9, HW)
    g2 = gamma.reshape(Cout, 1).astype(jnp.float32)
    b2 = beta.reshape(Cout, 1).astype(jnp.float32)

    inputs = [x, wmat, masks, g2, b2]
    spec_shapes = [(1, Cin, HW), (Cout, 9 * Cin), (9, HW), (Cout, 1), (Cout, 1)]
    in_specs = [
        pl.BlockSpec((1, Cin, HW), lambda n: (n, 0, 0)),
        pl.BlockSpec((Cout, 9 * Cin), lambda n: (0, 0)),
        pl.BlockSpec((9, HW), lambda n: (0, 0)),
        pl.BlockSpec((Cout, 1), lambda n: (0, 0)),
        pl.BlockSpec((Cout, 1), lambda n: (0, 0)),
    ]

    if upsample:
        lh = jnp.asarray(_interp_matrix(H), dtype=jnp.bfloat16)        # (2H, H)
        lwt = jnp.asarray(_interp_matrix(W).T, dtype=jnp.bfloat16)     # (W, 2W)
        inputs += [lh, lwt]
        spec_shapes += [(2 * H, H), (W, 2 * W)]
        in_specs += [
            pl.BlockSpec((2 * H, H), lambda n: (0, 0)),
            pl.BlockSpec((W, 2 * W), lambda n: (0, 0)),
        ]
        # Per-sample store is (Cout*2H, 2W) (NCHW order); wrapper only reshapes.
        out_block = (1, Cout * 2 * H, 2 * W)
        out_shape = jax.ShapeDtypeStruct((N, Cout * 2 * H, 2 * W), jnp.float32)
        out_spec = pl.BlockSpec(out_block, lambda n: (n, 0, 0))
    else:
        out_block = (1, Cout, HW)
        out_shape = jax.ShapeDtypeStruct((N, Cout, HW), jnp.float32)
        out_spec = pl.BlockSpec(out_block, lambda n: (n, 0, 0))

    # Scoped-VMEM limit sized from the actual (double-buffered) blocks + scratch, w/ headroom.
    vmem_bytes = _block_bytes((9 * Cin, HW), jnp.bfloat16)             # patches scratch
    for a, s in zip(inputs, spec_shapes):
        vmem_bytes += 2 * _block_bytes(s, a.dtype)
    vmem_bytes += 2 * _block_bytes(out_block, jnp.float32)
    vmem_limit = int(min(112 * 2 ** 20, max(32 * 2 ** 20, 4 * vmem_bytes)))

    kernel = _make_kernel(H, W, Cin, Cout, num_groups, eps, upsample)

    out = pl.pallas_call(
        kernel,
        grid=(N,),
        in_specs=in_specs,
        out_specs=out_spec,
        out_shape=out_shape,
        scratch_shapes=[pltpu.VMEM((9 * Cin, HW), jnp.bfloat16)],
        compiler_params=pltpu.CompilerParams(
            dimension_semantics=("parallel",),
            vmem_limit_bytes=vmem_limit),
    )(*inputs)

    if upsample:
        return out.reshape(N, Cout, 2 * H, 2 * W)
    return out.reshape(N, Cout, H, W)


def reference(x_nchw, weight, gamma, beta, *, num_groups=32, eps=1e-5,
              upsample=False):
    """Pure-JAX reference matching the PyTorch forward semantics."""
    y = jax.lax.conv_general_dilated(
        x_nchw, weight, window_strides=(1, 1), padding=((1, 1), (1, 1)),
        dimension_numbers=('NCHW', 'OIHW', 'NCHW'),
        precision=jax.lax.Precision.HIGHEST)
    N, C, H, W = y.shape
    g = num_groups
    yg = y.reshape(N, g, C // g, H, W)
    mean = yg.mean(axis=(2, 3, 4), keepdims=True)
    var = yg.var(axis=(2, 3, 4), keepdims=True)
    yn = (yg - mean) / jnp.sqrt(var + eps)
    yn = yn.reshape(N, C, H, W) * gamma.reshape(1, C, 1, 1) + beta.reshape(1, C, 1, 1)
    yn = jnp.maximum(yn, 0.0)
    if upsample:
        Lh = jnp.asarray(_interp_matrix(H))
        Lw = jnp.asarray(_interp_matrix(W))
        yn = jnp.einsum('ph,nchw,qw->ncpq', Lh, yn, Lw,
                        precision=jax.lax.Precision.HIGHEST)
    return yn


if __name__ == "__main__":
    key = jax.random.PRNGKey(0)
    k1, k2, k3, k4 = jax.random.split(key, 4)

    # GroupNorm(32, out_channels) requires out_channels % 32 == 0 -> Cout = 32.
    N, Cin, Cout, H, W = 2, 16, 32, 16, 16

    x = jax.random.normal(k1, (N, Cin, H, W), jnp.float32)
    weight = jax.random.normal(k2, (Cout, Cin, 3, 3), jnp.float32) * 0.1
    gamma = 1.0 + 0.1 * jax.random.normal(k3, (Cout,), jnp.float32)
    beta = 0.1 * jax.random.normal(k4, (Cout,), jnp.float32)

    for upsample in (False, True):
        out = jax.block_until_ready(
            conv3x3_gn_relu(x, weight, gamma, beta, upsample=upsample))
        ref = reference(x, weight, gamma, beta, upsample=upsample)
        assert out.shape == ref.shape, (out.shape, ref.shape)
        err = float(jnp.max(jnp.abs(out - ref)))
        assert err < 6e-2, f"upsample={upsample}: max abs err {err}"

    print("KERNEL_OK")
</pallas_src>

<mosaic_0001>
module attributes {stable_mosaic.version = 11 : i64} {
  func.func @kernel(%arg0: i32, %arg1: memref<1x16x256xbf16, #tpu.memory_space<vmem>>, %arg2: memref<32x144xbf16, #tpu.memory_space<vmem>>, %arg3: memref<9x256xbf16, #tpu.memory_space<vmem>>, %arg4: memref<32x1xf32, #tpu.memory_space<vmem>>, %arg5: memref<32x1xf32, #tpu.memory_space<vmem>>, %arg6: memref<1x32x256xf32, #tpu.memory_space<vmem>>, %arg7: memref<144x256xbf16, #tpu.memory_space<vmem>>) attributes {dimension_semantics = [#tpu.dimension_semantics<parallel>], iteration_bounds = array<i64: 2>, scalar_prefetch = 0 : i64, scratch_operands = 1 : i64, tpu.core_type = #tpu.core_type<tc>, window_params = [{transform_indices = @transform_0, window_bounds = array<i64: 1, 16, 256>}, {pipeline_mode = #tpu.pipeline_mode<synchronous>, transform_indices = @transform_1, window_bounds = array<i64: 32, 144>}, {pipeline_mode = #tpu.pipeline_mode<synchronous>, transform_indices = @transform_2, window_bounds = array<i64: 9, 256>}, {pipeline_mode = #tpu.pipeline_mode<synchronous>, transform_indices = @transform_3, window_bounds = array<i64: 32, 1>}, {pipeline_mode = #tpu.pipeline_mode<synchronous>, transform_indices = @transform_4, window_bounds = array<i64: 32, 1>}, {transform_indices = @transform_5, window_bounds = array<i64: 1, 32, 256>}]} {
    %c0 = arith.constant 0 : index
    %c0_0 = arith.constant 0 : index
    %c0_1 = arith.constant 0 : index
    %0 = vector.load %arg1[%c0, %c0_0, %c0_1] : memref<1x16x256xbf16, #tpu.memory_space<vmem>>, vector<1x16x256xbf16>
    %1 = vector.shape_cast %0 : vector<1x16x256xbf16> to vector<16x256xbf16>
    %2 = vector.extract_strided_slice %1 {offsets = [0, 239], sizes = [16, 17], strides = [1, 1]} : vector<16x256xbf16> to vector<16x17xbf16>
    %3 = vector.extract_strided_slice %1 {offsets = [0, 0], sizes = [16, 239], strides = [1, 1]} : vector<16x256xbf16> to vector<16x239xbf16>
    %4 = tpu.concatenate %2, %3 in 1 : vector<16x17xbf16>, vector<16x239xbf16> -> vector<16x256xbf16>
    %c0_2 = arith.constant 0 : index
    %c0_3 = arith.constant 0 : index
    %5 = vector.load %arg3[%c0_2, %c0_3] : memref<9x256xbf16, #tpu.memory_space<vmem>>, vector<1x256xbf16>
    %6 = vector.broadcast %5 : vector<1x256xbf16> to vector<16x256xbf16>
    %7 = arith.mulf %4, %6 : vector<16x256xbf16>
    %c0_4 = arith.constant 0 : index
    %c0_5 = arith.constant 0 : index
    %8 = vector.load %arg7[%c0_4, %c0_5] : memref<144x256xbf16, #tpu.memory_space<vmem>>, vector<16x256xbf16>
    tpu.vector_store %arg7[%c0_4, %c0_5], %7 {strides = array<i32>} : memref<144x256xbf16, #tpu.memory_space<vmem>>, vector<16x256xbf16>,
    %9 = vector.extract_strided_slice %1 {offsets = [0, 240], sizes = [16, 16], strides = [1, 1]} : vector<16x256xbf16> to vector<16x16xbf16>
    %10 = vector.extract_strided_slice %1 {offsets = [0, 0], sizes = [16, 240], strides = [1, 1]} : vector<16x256xbf16> to vector<16x240xbf16>
    %11 = tpu.concatenate %9, %10 in 1 : vector<16x16xbf16>, vector<16x240xbf16> -> vector<16x256xbf16>
    %c1 = arith.constant 1 : index
    %c0_6 = arith.constant 0 : index
    %12 = vector.load %arg3[%c1, %c0_6] : memref<9x256xbf16, #tpu.memory_space<vmem>>, vector<1x256xbf16>
    %13 = vector.broadcast %12 : vector<1x256xbf16> to vector<16x256xbf16>
    %14 = arith.mulf %11, %13 : vector<16x256xbf16>
    %c16 = arith.constant 16 : index
    %c0_7 = arith.constant 0 : index
    %15 = vector.load %arg7[%c16, %c0_7] : memref<144x256xbf16, #tpu.memory_space<vmem>>, vector<16x256xbf16>
    tpu.vector_store %arg7[%c16, %c0_7], %14 {strides = array<i32>} : memref<144x256xbf16, #tpu.memory_space<vmem>>, vector<16x256xbf16>,
    %16 = vector.extract_strided_slice %1 {offsets = [0, 241], sizes = [16, 15], strides = [1, 1]} : vector<16x256xbf16> to vector<16x15xbf16>
    %17 = vector.extract_strided_slice %1 {offsets = [0, 0], sizes = [16, 241], strides = [1, 1]} : vector<16x256xbf16> to vector<16x241xbf16>
    %18 = tpu.concatenate %16, %17 in 1 : vector<16x15xbf16>, vector<16x241xbf16> -> vector<16x256xbf16>
    %c2 = arith.constant 2 : index
    %c0_8 = arith.constant 0 : index
    %19 = vector.load %arg3[%c2, %c0_8] : memref<9x256xbf16, #tpu.memory_space<vmem>>, vector<1x256xbf16>
    %20 = vector.broadcast %19 : vector<1x256xbf16> to vector<16x256xbf16>
    %21 = arith.mulf %18, %20 : vector<16x256xbf16>
    %c32 = arith.constant 32 : index
    %c0_9 = arith.constant 0 : index
    %22 = vector.load %arg7[%c32, %c0_9] : memref<144x256xbf16, #tpu.memory_space<vmem>>, vector<16x256xbf16>
    tpu.vector_store %arg7[%c32, %c0_9], %21 {strides = array<i32>} : memref<144x256xbf16, #tpu.memory_space<vmem>>, vector<16x256xbf16>,
    %23 = vector.extract_strided_slice %1 {offsets = [0, 255], sizes = [16, 1], strides = [1, 1]} : vector<16x256xbf16> to vector<16x1xbf16>
    %24 = vector.extract_strided_slice %1 {offsets = [0, 0], sizes = [16, 255], strides = [1, 1]} : vector<16x256xbf16> to vector<16x255xbf16>
    %25 = tpu.concatenate %23, %24 in 1 : vector<16x1xbf16>, vector<16x255xbf16> -> vector<16x256xbf16>
    %c3 = arith.constant 3 : index
    %c0_10 = arith.constant 0 : index
    %26 = vector.load %arg3[%c3, %c0_10] : memref<9x256xbf16, #tpu.memory_space<vmem>>, vector<1x256xbf16>
    %27 = vector.broadcast %26 : vector<1x256xbf16> to vector<16x256xbf16>
    %28 = arith.mulf %25, %27 : vector<16x256xbf16>
    %c48 = arith.constant 48 : index
    %c0_11 = arith.constant 0 : index
    %29 = vector.load %arg7[%c48, %c0_11] : memref<144x256xbf16, #tpu.memory_space<vmem>>, vector<16x256xbf16>
    tpu.vector_store %arg7[%c48, %c0_11], %28 {strides = array<i32>} : memref<144x256xbf16, #tpu.memory_space<vmem>>, vector<16x256xbf16>,
    %c64 = arith.constant 64 : index
    %c0_12 = arith.constant 0 : index
    %30 = vector.load %arg7[%c64, %c0_12] : memref<144x256xbf16, #tpu.memory_space<vmem>>, vector<16x256xbf16>
    tpu.vector_store %arg7[%c64, %c0_12], %1 {strides = array<i32>} : memref<144x256xbf16, #tpu.memory_space<vmem>>, vector<16x256xbf16>,
    %31 = vector.extract_strided_slice %1 {offsets = [0, 1], sizes = [16, 255], strides = [1, 1]} : vector<16x256xbf16> to vector<16x255xbf16>
    %32 = vector.extract_strided_slice %1 {offsets = [0, 0], sizes = [16, 1], strides = [1, 1]} : vector<16x256xbf16> to vector<16x1xbf16>
    %33 = tpu.concatenate %31, %32 in 1 : vector<16x255xbf16>, vector<16x1xbf16> -> vector<16x256xbf16>
    %c5 = arith.constant 5 : index
    %c0_13 = arith.constant 0 : index
    %34 = vector.load %arg3[%c5, %c0_13] : memref<9x256xbf16, #tpu.memory_space<vmem>>, vector<1x256xbf16>
    %35 = vector.broadcast %34 : vector<1x256xbf16> to vector<16x256xbf16>
    %36 = arith.mulf %33, %35 : vector<16x256xbf16>
    %c80 = arith.constant 80 : index
    %c0_14 = arith.constant 0 : index
    %37 = vector.load %arg7[%c80, %c0_14] : memref<144x256xbf16, #tpu.memory_space<vmem>>, vector<16x256xbf16>
    tpu.vector_store %arg7[%c80, %c0_14], %36 {strides = array<i32>} : memref<144x256xbf16, #tpu.memory_space<vmem>>, vector<16x256xbf16>,
    %38 = vector.extract_strided_slice %1 {offsets = [0, 15], sizes = [16, 241], strides = [1, 1]} : vector<16x256xbf16> to vector<16x241xbf16>
    %39 = vector.extract_strided_slice %1 {offsets = [0, 0], sizes = [16, 15], strides = [1, 1]} : vector<16x256xbf16> to vector<16x15xbf16>
    %40 = tpu.concatenate %38, %39 in 1 : vector<16x241xbf16>, vector<16x15xbf16> -> vector<16x256xbf16>
    %c6 = arith.constant 6 : index
    %c0_15 = arith.constant 0 : index
    %41 = vector.load %arg3[%c6, %c0_15] : memref<9x256xbf16, #tpu.memory_space<vmem>>, vector<1x256xbf16>
    %42 = vector.broadcast %41 : vector<1x256xbf16> to vector<16x256xbf16>
    %43 = arith.mulf %40, %42 : vector<16x256xbf16>
    %c96 = arith.constant 96 : index
    %c0_16 = arith.constant 0 : index
    %44 = vector.load %arg7[%c96, %c0_16] : memref<144x256xbf16, #tpu.memory_space<vmem>>, vector<16x256xbf16>
    tpu.vector_store %arg7[%c96, %c0_16], %43 {strides = array<i32>} : memref<144x256xbf16, #tpu.memory_space<vmem>>, vector<16x256xbf16>,
    %45 = vector.extract_strided_slice %1 {offsets = [0, 16], sizes = [16, 240], strides = [1, 1]} : vector<16x256xbf16> to vector<16x240xbf16>
    %46 = vector.extract_strided_slice %1 {offsets = [0, 0], sizes = [16, 16], strides = [1, 1]} : vector<16x256xbf16> to vector<16x16xbf16>
    %47 = tpu.concatenate %45, %46 in 1 : vector<16x240xbf16>, vector<16x16xbf16> -> vector<16x256xbf16>
    %c7 = arith.constant 7 : index
    %c0_17 = arith.constant 0 : index
    %48 = vector.load %arg3[%c7, %c0_17] : memref<9x256xbf16, #tpu.memory_space<vmem>>, vector<1x256xbf16>
    %49 = vector.broadcast %48 : vector<1x256xbf16> to vector<16x256xbf16>
    %50 = arith.mulf %47, %49 : vector<16x256xbf16>
    %c112 = arith.constant 112 : index
    %c0_18 = arith.constant 0 : index
    %51 = vector.load %arg7[%c112, %c0_18] : memref<144x256xbf16, #tpu.memory_space<vmem>>, vector<16x256xbf16>
    tpu.vector_store %arg7[%c112, %c0_18], %50 {strides = array<i32>} : memref<144x256xbf16, #tpu.memory_space<vmem>>, vector<16x256xbf16>,
    %52 = vector.extract_strided_slice %1 {offsets = [0, 17], sizes = [16, 239], strides = [1, 1]} : vector<16x256xbf16> to vector<16x239xbf16>
    %53 = vector.extract_strided_slice %1 {offsets = [0, 0], sizes = [16, 17], strides = [1, 1]} : vector<16x256xbf16> to vector<16x17xbf16>
    %54 = tpu.concatenate %52, %53 in 1 : vector<16x239xbf16>, vector<16x17xbf16> -> vector<16x256xbf16>
    %c8 = arith.constant 8 : index
    %c0_19 = arith.constant 0 : index
    %55 = vector.load %arg3[%c8, %c0_19] : memref<9x256xbf16, #tpu.memory_space<vmem>>, vector<1x256xbf16>
    %56 = vector.broadcast %55 : vector<1x256xbf16> to vector<16x256xbf16>
    %57 = arith.mulf %54, %56 : vector<16x256xbf16>
    %c128 = arith.constant 128 : index
    %c0_20 = arith.constant 0 : index
    %58 = vector.load %arg7[%c128, %c0_20] : memref<144x256xbf16, #tpu.memory_space<vmem>>, vector<16x256xbf16>
    tpu.vector_store %arg7[%c128, %c0_20], %57 {strides = array<i32>} : memref<144x256xbf16, #tpu.memory_space<vmem>>, vector<16x256xbf16>,
    %c0_21 = arith.constant 0 : index
    %c0_22 = arith.constant 0 : index
    %59 = vector.load %arg2[%c0_21, %c0_22] : memref<32x144xbf16, #tpu.memory_space<vmem>>, vector<32x144xbf16>
    %c0_23 = arith.constant 0 : index
    %c0_24 = arith.constant 0 : index
    %60 = vector.load %arg7[%c0_23, %c0_24] : memref<144x256xbf16, #tpu.memory_space<vmem>>, vector<144x256xbf16>
    %cst = arith.constant dense<0.000000e+00> : vector<32x256xf32>
    %61 = tpu.matmul %59, %60, %cst {dimension_numbers = #tpu.dot_dimension_numbers<[1], [0], [0], [1], [0, 0, 1, 1], [], []>} : vector<32x144xbf16>, vector<144x256xbf16>, vector<32x256xf32> -> vector<32x256xf32>
    %cst_25 = arith.constant dense<0.000000e+00> : vector<32xf32>
    %62 = vector.multi_reduction <add>, %61, %cst_25 [1] : vector<32x256xf32> to vector<32xf32>
    %63 = vector.shape_cast %62 : vector<32xf32> to vector<32x1xf32>
    %cst_26 = arith.constant 3.906250e-03 : f32
    %64 = vector.broadcast %cst_26 : f32 to vector<32x1xf32>
    %65 = arith.mulf %63, %64 : vector<32x1xf32>
    %66 = vector.broadcast %65 : vector<32x1xf32> to vector<32x256xf32>
    %67 = arith.subf %61, %66 : vector<32x256xf32>
    %68 = arith.mulf %67, %67 : vector<32x256xf32>
    %cst_27 = arith.constant dense<0.000000e+00> : vector<32xf32>
    %69 = vector.multi_reduction <add>, %68, %cst_27 [1] : vector<32x256xf32> to vector<32xf32>
    %70 = vector.shape_cast %69 : vector<32xf32> to vector<32x1xf32>
    %cst_28 = arith.constant 3.906250e-03 : f32
    %71 = vector.broadcast %cst_28 : f32 to vector<32x1xf32>
    %72 = arith.mulf %70, %71 : vector<32x1xf32>
    %cst_29 = arith.constant 9.99999974E-6 : f32
    %73 = vector.broadcast %cst_29 : f32 to vector<32x1xf32>
    %74 = arith.addf %72, %73 : vector<32x1xf32>
    %75 = math.rsqrt %74 : vector<32x1xf32>
    %c0_30 = arith.constant 0 : index
    %c0_31 = arith.constant 0 : index
    %76 = vector.load %arg4[%c0_30, %c0_31] : memref<32x1xf32, #tpu.memory_space<vmem>>, vector<32x1xf32>
    %77 = arith.mulf %75, %76 : vector<32x1xf32>
    %78 = vector.broadcast %77 : vector<32x1xf32> to vector<32x256xf32>
    %79 = arith.mulf %67, %78 : vector<32x256xf32>
    %c0_32 = arith.constant 0 : index
    %c0_33 = arith.constant 0 : index
    %80 = vector.load %arg5[%c0_32, %c0_33] : memref<32x1xf32, #tpu.memory_space<vmem>>, vector<32x1xf32>
    %81 = vector.broadcast %80 : vector<32x1xf32> to vector<32x256xf32>
    %82 = arith.addf %79, %81 : vector<32x256xf32>
    %cst_34 = arith.constant 0.000000e+00 : f32
    %83 = vector.broadcast %cst_34 : f32 to vector<32x256xf32>
    %84 = arith.maximumf %82, %83 : vector<32x256xf32>
    %c0_35 = arith.constant 0 : index
    %c0_36 = arith.constant 0 : index
    %c0_37 = arith.constant 0 : index
    %85 = vector.load %arg6[%c0_35, %c0_36, %c0_37] : memref<1x32x256xf32, #tpu.memory_space<vmem>>, vector<1x32x256xf32>
    %86 = vector.shape_cast %85 : vector<1x32x256xf32> to vector<32x256xf32>
    %87 = vector.shape_cast %84 : vector<32x256xf32> to vector<1x32x256xf32>
    tpu.vector_store %arg6[%c0_35, %c0_36, %c0_37], %87 {strides = array<i32>} : memref<1x32x256xf32, #tpu.memory_space<vmem>>, vector<1x32x256xf32>,
    return
  }
  func.func @transform_0(%arg0: i32) -> (i32, i32, i32) {
    %c0_i32 = arith.constant 0 : i32
    %c0_i32_0 = arith.constant 0 : i32
    %c0_i32_1 = arith.constant 0 : i32
    return %arg0, %c0_i32, %c0_i32_0 : i32, i32, i32
  }
  func.func @transform_1(%arg0: i32) -> (i32, i32) {
    %c0_i32 = arith.constant 0 : i32
    %c0_i32_0 = arith.constant 0 : i32
    %c0_i32_1 = arith.constant 0 : i32
    return %c0_i32, %c0_i32_0 : i32, i32
  }
  func.func @transform_2(%arg0: i32) -> (i32, i32) {
    %c0_i32 = arith.constant 0 : i32
    %c0_i32_0 = arith.constant 0 : i32
    %c0_i32_1 = arith.constant 0 : i32
    return %c0_i32, %c0_i32_0 : i32, i32
  }
  func.func @transform_3(%arg0: i32) -> (i32, i32) {
    %c0_i32 = arith.constant 0 : i32
    %c0_i32_0 = arith.constant 0 : i32
    %c0_i32_1 = arith.constant 0 : i32
    return %c0_i32, %c0_i32_0 : i32, i32
  }
  func.func @transform_4(%arg0: i32) -> (i32, i32) {
    %c0_i32 = arith.constant 0 : i32
    %c0_i32_0 = arith.constant 0 : i32
    %c0_i32_1 = arith.constant 0 : i32
    return %c0_i32, %c0_i32_0 : i32, i32
  }
  func.func @transform_5(%arg0: i32) -> (i32, i32, i32) {
    %c0_i32 = arith.constant 0 : i32
    %c0_i32_0 = arith.constant 0 : i32
    %c0_i32_1 = arith.constant 0 : i32
    return %arg0, %c0_i32, %c0_i32_0 : i32, i32, i32
  }
}

</mosaic_0001>

<bundles_post_ra>
// kernel: tpu_custom_call.1
= control target key start
LH: loop header
LB: loop body
LE: loop exit
PB: predicated region body
PF: predicated region fallthrough
CT: control target
= control target key end

     0   :  { %10 = vsyncpa [#allocation4], 0  ;;  %s1457_s0 = inlined_call_operand.vmem [shape: bf16[2,16,256], index: 0, kind: input, shape index: {}]   ;;  %s1458_s1 = inlined_call_operand.vmem [shape: bf16[32,144], index: 1, kind: input, shape index: {}]   ;;  %s1459_s2 = inlined_call_operand.hbm [shape: bf16[9,256], index: 2, kind: input, shape index: {}]   ;;  %s1460_s3 = inlined_call_operand.vmem [shape: f32[32,1], index: 3, kind: input, shape index: {}]   ;;  %s1461_s4 = inlined_call_operand.vmem [shape: f32[32,1], index: 4, kind: input, shape index: {}]   ;;  %s1462_s5 = inlined_call_operand.hbm [shape: f32[2,32,256], index: 5, kind: output, shape index: {}]  }
   0x1   :  { %11 = vsyncpa [#allocation5], 0 }
   0x2   :  { %13 = vsyncpa [#allocation5 + $0x1], 0  ;;  %s1171_s18 = smov 0   ;;  %s1173_s19 = smov 0  }
   0x3   :  { %s1175_s20 = smov 0   ;;  %s1177_s21 = smov 0  }
   0x4 LB: > { %s1192_s22 = sadd.s32 4294967295, %s1125_s21   ;;  %s876_s23 = sadd.s32 4294967294, %s1125_s21   ;;  %s1125_s21 = sphi %s1177_s21, %s1478_s21   ;;  %s1121_s20 = sphi %s1175_s20, %s1477_s20   ;;  %s1117_s19 = sphi %s1173_s19, %s1476_s19   ;;  %s1113_s18 = sphi %s1171_s18, %s1475_s18  }
   0x5   : > { %s1196_s24 = sadd.s32 1, %s1125_s21   ;;  %s136_s25 = sadd.s32 1, %s1121_s20 }
   0x6   : > { %s133_s26 = ssub.s32 %s1125_s21, %s1196_s24  ;;  %p146_p0 = scmp.ne.s32.totalorder %s1121_s20, %s1117_s19 }
   0x7   : > { %p134_p1 = scmp.eq.s32.totalorder %s133_s26, 0  ;;  %p147_p2 = scmp.eq.s32.totalorder %s1192_s22, 1 }
   0x8   : > { %p152_p3 = scmp.ne.s32.totalorder %s1117_s19, %s1113_s18  ;;  %p153_p4 = scmp.eq.s32.totalorder %s876_s23, 1 }
   0x9   : > { %s1207_s27 = scalar_select %p134_p1, %s1121_s20, %s136_s25  }
   0xa   : > { %p1209_p5 = por %p147_p2, %p146_p0  ;;  %p1213_p6 = por %p153_p4, %p152_p3 }
   0xb   : > { %p877_p7 = scmp.ge.s32.totalorder %s1125_s21, 1  ;;  %p160_p8 = scmp.lt.s32.totalorder %s1125_s21, 3 }
   0xc   : > { %s1466_s28 = scalar_select %p1209_p5, 1, 0 }
   0xd   : > { %s1467_s29 = scalar_select %p1213_p6, 1, 0 }
   0xe   : > { %p1463_p9 = scmp.eq.s32.totalorder %s1192_s22, 0  ;;  %p1220_p10 = pnand %p877_p7, %p160_p8 }
   0xf   : > { %s1127_s6 = smov [#allocation3]   ;;  %s1031_s11 = scalar_lea.hbm %s1459_s2, 256 }
  0x10   : > { %s1468_s30 = scalar_select %p1220_p10, 1, 0 }
  0x11   : > { %s175_s7 = sshll.u32 %s1127_s6, 4  ;;  %p940_p11 = pneg %p1220_p10  ;;  %s176_s7 = int_to_ptr.vmem [resolvable:$true] %s175_s7 }
  0x12   : > { %p1032_p13 = scmp.ne.s32.totalorder %s1459_s2, %s1031_s11  ;;  %p1038_p3 = scmp.lt.u32.totalorder %s1031_s11, %s1459_s2 }
  0x13   : > { %p1228_p12 = pnand %p1463_p9, %p940_p11 }
  0x15   : > { %p1033_p0 = pneg %p1228_p12 }
  0x17   : > { %p1034_p1 = pnand %p1033_p0, %p1032_p13 }
  0x19   : > { %p1035_p2 = pneg %p1034_p1 }
  0x1b   : > { %p1040_p4 = pnand %p1038_p3, %p1035_p2 }
  0x1d   : > { %1043 = shalt.err (!%p1040_p4)
}
  0x1e   : > { %s1044_s16 = scalar_lea.vmem %s176_s7, 256  ;;  %p1052_p9 = scmp.lt.s32.totalorder %s176_s7, %s176_s7 }
  0x1f   : > { %p1045_p7 = scmp.ne.s32.totalorder %s176_s7, %s1044_s16  ;;  %p1053_p6 = scmp.lt.s32.totalorder %s1044_s16, %s1044_s16 }
  0x21   : > { %p1047_p8 = pnand %p1045_p7, %p1033_p0  ;;  %p1054_p5 = por %p1053_p6, %p1052_p9 }
  0x23   : > { %p1048_p11 = pneg %p1047_p8 }
  0x25   : > { %p1055_p10 = pnand %p1054_p5, %p1048_p11 }
  0x27   : > { %1058 = shalt.err (!%p1055_p10)
}
  0x28   : > { %s1128_s17 = smov 128   ;;  %s1129_s23 = smov 8  }
  0x29   : > { %943 = dma.hbm_to_vmem [thread:$0]  (!%p1228_p12), %s1459_s2, 256, %s176_s7, [#allocation4], %s1128_s17, %s1128_s17, %s1129_s23  }
  0x2a   : > { %p1470_p13 = scmp.ne.s32.totalorder %s1468_s30, 0 }
  0x2b   : > { %p1471_p1 = scmp.eq.s32.totalorder (!%p1470_p13), %s1192_s22, 0 }
  0x2c   : > { %205 = sbr.rel (%p1470_p13) target bundleno = 913 (0x391), region = 40 }
  0x33   : > { %1104 = dma.done.wait (%p1471_p1), [#allocation4], 256   ;;  %p1472_p0 = pmov %p1471_p1 }
  0x34   : > { %p233_p5 = scmp.lt.s32.totalorder %s1192_s22, 1  ;;  %s1130_s7 = smov 16   ;;  %v1019_v2 = vld [vmem:[%s1458_s1 + $0x4] ss:$8 sps:$4 sm:$0xff]   ;;  %vm289_vm0 = vcmask 130048   ;;  %v270_v5 = vlaneseq  ;;  %vm253_vm1 = vcmask 138240  }
  0x35   : > { %1106 = vsyncadd (%p1472_p0), [#allocation4], 4294967040  ;;  %s1131_s30 = smov 17   ;;  %s1132_s12 = smov 15   ;;  %v1022_v3 = vld [vmem:[%s1458_s1 + $0x14] ss:$8 sps:$4 sm:$0xff]   ;;  %907 = vmatprep.mubr.msk.bf16.mxu0 %vm289_vm0, %v1019_v2 }
  0x36   : > { %s234_s6 = scalar_select %p233_p5, %s1192_s22, 1  ;;  %908 = vmatprep.mubr.msk.bf16.mxu1 %vm289_vm0, %v1022_v3  ;;  %v297_v4 = vld [vmem:[#allocation3] sm:$0x11]  ;;  %v1289_v8 = vshrl.u32 %v270_v5, 7  ;;  %v335_v11 = vld [vmem:[#allocation3] sm:$0x22] }
  0x37   : > { %s1133_s13 = smov 1   ;;  %s1134_s14 = smov 127   ;;  %v261_v6 = vld [vmem:[#allocation3] sm:$0x11]  ;;  %v890_v7 = vcombine.high %v297_v4, %v297_v4  ;;  %v889_v12 = vcombine.low %v297_v4, %v297_v4  ;;  %v371_v13 = vld [vmem:[#allocation3] sm:$0x22]  ;;  %v892_v15 = vcombine.high %v335_v11, %v335_v11  ;;  %v891_v25 = vcombine.low %v335_v11, %v335_v11 }
  0x38   : > { %s914_s9 = sshll.u32 %s234_s6, 4  ;;  %s1135_s15 = smov 113   ;;  %v888_v9 = vcombine.high %v261_v6, %v261_v6  ;;  %v887_v10 = vcombine.low %v261_v6, %v261_v6  ;;  %v1292_v16 = vsub.s32 0, %v1289_v8  ;;  %v894_v19 = vcombine.high %v371_v13, %v371_v13  ;;  %v413_v33 = vld [vmem:[#allocation3] sm:$0x44] }
  0x39   : > { %s237_s11 = scalar_lea.vmem %s1457_s0, %s914_s9  ;;  %s1136_s16 = smov 112   ;;  %v312_v14 = vshrl.u32 %v890_v7, 16  ;;  %v304_v20 = vshrl.u32 %v889_v12, 16  ;;  %v893_v21 = vcombine.low %v371_v13, %v371_v13  ;;  %v346_v26 = vsub.s32 1, %v1289_v8  ;;  %v451_v55 = vld [vmem:[#allocation3] sm:$0x88] }
  0x3a   : > { %v1259_v0 = vld [vmem:[%s237_s11 + $0x4] ss:$8 sps:$4 sm:$0xff]   ;;  %v1264_v1 = vld [vmem:[%s237_s11] ss:$8 sps:$4 sm:$0xff]   ;;  %s1137_s25 = smov 111   ;;  %v275_v17 = vpack.i.b16 %v888_v9, %v888_v9  ;;  %v268_v18 = vpack.i.b16 %v887_v10, %v887_v10  ;;  %v349_v27 = vpack.i.b16 %v892_v15, %v892_v15  ;;  %v386_v30 = vshrl.u32 %v894_v19, 16 }
  0x3b   : > { %285 = vrot.lane.b32.xlu1 %v1259_v0, %s1130_s7  ;;  %246 = vrot.lane.b32.xlu0 %v1259_v0, %s1131_s30  ;;  %v313_v24 = vpack.i.b16 %v312_v14, %v312_v14  ;;  %v305_v31 = vpack.i.b16 %v304_v20, %v304_v20  ;;  %v378_v32 = vshrl.u32 %v893_v21, 16  ;;  %vm327_vm2 = vcmask 121856   ;;  %v487_v60 = vld [vmem:[#allocation3] sm:$0x88]  ;;  %p1473_p9 = scmp.ne.s32.totalorder %s1466_s28, 0  ;;  %s1139_s6 = smov [#allocation6]  }
  0x3c   : > { %v280_v28 = vrot.slane %v275_v17, %v1292_v16  ;;  %v273_v29 = vrot.slane %v268_v18, %v1292_v16  ;;  %v342_v37 = vpack.i.b16 %v891_v25, %v891_v25  ;;  %v354_v41 = vrot.slane %v349_v27, %v346_v26  ;;  %v525_v25 = vld [vmem:[#allocation3 + $0x8] sm:$0x11]  ;;  %s1063_s9 = sshll.u32 %s1139_s6, 4  ;;  %s1064_s9 = int_to_ptr.vmem [resolvable:$false] %s1063_s9 }
  0x3d   : > { %v318_v34 = vrot.slane %v313_v24, %v1292_v16  ;;  %v387_v44 = vpack.i.b16 %v386_v30, %v386_v30  ;;  %v896_v45 = vcombine.high %v413_v33, %v413_v33  ;;  %v310_v46 = vrot.slane %v305_v31, %v1292_v16  ;;  %s1065_s10 = scalar_lea.vmem %s1064_s9, 2048 }
  0x3e   : > { %v379_v47 = vpack.i.b16 %v378_v32, %v378_v32  ;;  %v895_v52 = vcombine.low %v413_v33, %v413_v33  ;;  %v347_v53 = vrot.slane %v342_v37, %v346_v26  ;;  %vm363_vm3 = vcmask 7168  }
  0x3f   : > { %287 = vrot.lane.b32.xlu1 %v1264_v1, %s1130_s7  ;;  %251 = vrot.lane.b32.xlu0 %v1264_v1, %s1131_s30  ;;  %v392_v58 = vrot.slane %v387_v44, %v346_v26  ;;  %v428_v59 = vshrl.u32 %v896_v45, 16  ;;  %v898_v4 = vcombine.high %v451_v55, %v451_v55  ;;  %v900_v7 = vcombine.high %v487_v60, %v487_v60 }
  0x40   : > { %v384_v63 = vrot.slane %v379_v47, %v346_v26  ;;  %v420_v3 = vshrl.u32 %v895_v52, 16  ;;  %v425_v11 = vsub.s32 2, %v1289_v8  ;;  %vm405_vm4 = vcmask 1039360  }
  0x41   : > { %v429_v12 = vpack.i.b16 %v428_v59, %v428_v59  ;;  %v897_v17 = vcombine.low %v451_v55, %v451_v55  ;;  %v899_v18 = vcombine.low %v487_v60, %v487_v60  ;;  %v462_v20 = vsub.s32 3, %v1289_v8  ;;  %v1017_v59 = vld [vmem:[%s1458_s1] ss:$8 sps:$4 sm:$0xff]   ;;  %v1020_v60 = vld [vmem:[%s1458_s1 + $0x10] ss:$8 sps:$4 sm:$0xff]  }
  0x42   : > { %v421_v14 = vpack.i.b16 %v420_v3, %v420_v3  ;;  %v465_v21 = vpack.i.b16 %v898_v4, %v898_v4  ;;  %vm443_vm5 = vcmask 924672   ;;  %vm479_vm6 = vcmask 916480  }
  0x43   : > { %325 = vrot.lane.b32.xlu1 %v1264_v1, %s1132_s12  ;;  %323 = vrot.lane.b32.xlu0 %v1259_v0, %s1132_s12  ;;  %v458_v27 = vpack.i.b16 %v897_v17, %v897_v17  ;;  %vm517_vm7 = vcmask 908288   ;;  %s230_s12 = sand.u32 1, %s1117_s19  }
  0x44   : > { %v426_v30 = vrot.slane %v421_v14, %v425_v11  ;;  %v470_v31 = vrot.slane %v465_v21, %v462_v20  ;;  %s1415_s26 = scalar_lea.sflag [#allocation5], %s230_s12 }
  0x47   : > { %361 = vrot.lane.b32.xlu1 %v1264_v1, %s1133_s13  ;;  %359 = vrot.lane.b32.xlu0 %v1259_v0, %s1133_s13  ;;  %s882_s13 = sshll.u32 %s230_s12, 6 }
  0x4b   : > { %403 = vrot.lane.b32.xlu1 %v1259_v0, %s1134_s14  ;;  %401 = vrot.lane.b32.xlu0 %v1264_v1, %s1134_s14  ;;  %s1390_s14 = scalar_lea.vmem [#allocation6], %s882_s13 }
  0x4f   : > { %441 = vrot.lane.b32.xlu1 %v1259_v0, %s1135_s15  ;;  %439 = vrot.lane.b32.xlu0 %v1264_v1, %s1135_s15  ;;  %s802_s15 = sshll.u32 %s1390_s14, 4  ;;  %s1404_s15 = int_to_ptr.vmem [resolvable:$true] %s802_s15 }
  0x50   : > { %p1066_p2 = scmp.lt.s32.totalorder %s1404_s15, %s1064_s9 }
  0x53   : > { %477 = vrot.lane.b32.xlu1 %v1259_v0, %s1136_s16  ;;  %475 = vrot.lane.b32.xlu0 %v1264_v1, %s1136_s16  ;;  %s915_s16 = sshll.u32 %s1192_s22, 10  ;;  %s1059_s22 = scalar_lea.vmem %s1404_s15, 1024 }
  0x54   : > { %p1060_p6 = scmp.ne.s32.totalorder %s1404_s15, %s1059_s22  ;;  %p1067_p3 = scmp.lt.s32.totalorder %s1065_s10, %s1059_s22 }
  0x56   : > { %p1061_p10 = pnand %p1060_p6, %p1473_p9  ;;  %p1068_p4 = por %p1067_p3, %p1066_p2 }
  0x57   : > { %515 = vrot.lane.b32.xlu1 %v1259_v0, %s1137_s25  ;;  %513 = vrot.lane.b32.xlu0 %v1264_v1, %s1137_s25  ;;  %s1409_s25 = scalar_lea.hbm %s1462_s5, %s915_s16 }
  0x58   : > { %p1062_p12 = pneg %p1061_p10 }
  0x5a   : > { %p1069_p7 = pnand %p1068_p4, %p1062_p12 }
  0xad   : > { %v286_v22 = vpop.permute.xlu1 %285  ;;  %v247_v23 = vpop.permute.xlu0 %246 }
  0xb1   : > { %v288_v35 = vpop.permute.xlu1 %287  ;;  %v252_v36 = vpop.permute.xlu0 %251 }
  0xb2   : > { %v290_v38 = vsel %vm289_vm0, %v288_v35, %v286_v22  ;;  %v254_v39 = vsel %vm253_vm1, %v252_v36, %v247_v23  ;;  %v259_v40 = vsel %vm253_vm1, %v247_v23, %v252_v36  ;;  %v295_v48 = vsel %vm289_vm0, %v286_v22, %v288_v35 }
  0xb3   : > { %v282_v42 = vmul.bf16 %v280_v28, %v254_v39  ;;  %v281_v43 = vmul.bf16 %v273_v29, %v259_v40  ;;  %v320_v49 = vmul.bf16 %v318_v34, %v290_v38  ;;  %v319_v61 = vmul.bf16 %v310_v46, %v295_v48 }
  0xb4   : > { %v502_v22 = vshrl.u32 %v900_v7, 16  ;;  %v434_v23 = vrot.slane %v429_v12, %v425_v11  ;;  %v494_v29 = vshrl.u32 %v899_v18, 16  ;;  %v902_v34 = vcombine.high %v525_v25, %v525_v25 }
  0xb5   : > { %595 = vmatprep.subr.bf16.mxu0 %v282_v42  ;;  %916 = vmatprep.subr.bf16.mxu1 %v282_v42  ;;  %v326_v50 = vpop.permute.xlu1 %325  ;;  %v324_v51 = vpop.permute.xlu0 %323  ;;  %v463_v36 = vrot.slane %v458_v27, %v462_v20  ;;  %v901_v42 = vcombine.low %v525_v25, %v525_v25 }
  0xb6   : > { %596 = vmatpush1.bf16.msra.mxu0 %v281_v43  ;;  %925 = vmatpush1.bf16.msra.mxu1 %v281_v43  ;;  %v328_v54 = vsel %vm327_vm2, %v326_v50, %v324_v51  ;;  %v333_v56 = vsel %vm327_vm2, %v324_v51, %v326_v50  ;;  %v503_v32 = vpack.i.b16 %v502_v22, %v502_v22 }
  0xb7   : > { %597 = vmatprep.subr.bf16.mxu0 %v320_v49  ;;  %917 = vmatprep.subr.bf16.mxu1 %v320_v49  ;;  %v356_v57 = vmul.bf16 %v354_v41, %v328_v54  ;;  %v355_v5 = vmul.bf16 %v347_v53, %v333_v56  ;;  %v495_v38 = vpack.i.b16 %v494_v29, %v494_v29 }
  0xb8   : > { %v508_v41 = vrot.slane %v503_v32, %v462_v20  ;;  %v539_v44 = vpack.i.b16 %v902_v34, %v902_v34  ;;  %v532_v50 = vpack.i.b16 %v901_v42, %v901_v42 }
  0xb9   : > { %v362_v62 = vpop.permute.xlu1 %361  ;;  %v360_v2 = vpop.permute.xlu0 %359  ;;  %v500_v49 = vrot.slane %v495_v38, %v462_v20 }
  0xba   : > { %598 = vmatpush1.bf16.msra.mxu0 %v319_v61  ;;  %926 = vmatpush1.bf16.msra.mxu1 %v319_v61  ;;  %v364_v6 = vsel %vm363_vm3, %v362_v62, %v360_v2  ;;  %v369_v9 = vsel %vm363_vm3, %v360_v2, %v362_v62  ;;  %v544_v52 = vrot.slane %v539_v44, %v1292_v16 }
  0xbb   : > { %599 = vmatprep.subr.bf16.mxu0 %v356_v57  ;;  %918 = vmatprep.subr.bf16.mxu1 %v356_v57  ;;  %v394_v10 = vmul.bf16 %v392_v58, %v364_v6  ;;  %v393_v19 = vmul.bf16 %v384_v63, %v369_v9  ;;  %v537_v55 = vrot.slane %v532_v50, %v1292_v16  ;;  %v705_v50 = vld [vmem:[%s1460_s3 + $0x8] sm:$0xff] }
  0xbd   : > { %v404_v13 = vpop.permute.xlu1 %403  ;;  %v402_v15 = vpop.permute.xlu0 %401 }
  0xbe   : > { %600 = vmatpush1.bf16.msra.mxu0 %v355_v5  ;;  %927 = vmatpush1.bf16.msra.mxu1 %v355_v5  ;;  %v411_v24 = vsel %vm405_vm4, %v404_v13, %v402_v15  ;;  %v406_v8 = vsel %vm405_vm4, %v402_v15, %v404_v13 }
  0xbf   : > { %601 = vmatprep.subr.bf16.mxu0 %v394_v10  ;;  %919 = vmatprep.subr.bf16.mxu1 %v394_v10  ;;  %v436_v33 = vmul.bf16 %v434_v23, %v411_v24  ;;  %v435_v40 = vmul.bf16 %v426_v30, %v406_v8 }
  0xc1   : > { %v442_v26 = vpop.permute.xlu1 %441  ;;  %v440_v28 = vpop.permute.xlu0 %439 }
  0xc2   : > { %602 = vmatpush1.bf16.msra.mxu0 %v393_v19  ;;  %928 = vmatpush1.bf16.msra.mxu1 %v393_v19  ;;  %v449_v35 = vsel %vm443_vm5, %v442_v26, %v440_v28 }
  0xc3   : > { %603 = vmatprep.subr.bf16.mxu0 %v1259_v0  ;;  %920 = vmatprep.subr.bf16.mxu1 %v1259_v0  ;;  %v444_v0 = vsel %vm443_vm5, %v440_v28, %v442_v26  ;;  %v472_v43 = vmul.bf16 %v470_v31, %v449_v35 }
  0xc4   : > { %v471_v48 = vmul.bf16 %v463_v36, %v444_v0 }
  0xc5   : > { %v478_v37 = vpop.permute.xlu1 %477  ;;  %v476_v39 = vpop.permute.xlu0 %475 }
  0xc6   : > { %604 = vmatpush1.bf16.msra.mxu0 %v1264_v1  ;;  %929 = vmatpush1.bf16.msra.mxu1 %v1264_v1  ;;  %v485_v45 = vsel %vm479_vm6, %v478_v37, %v476_v39  ;;  %v480_v1 = vsel %vm479_vm6, %v476_v39, %v478_v37  ;;  %v1138_v39 = vmov 0  }
  0xc7   : > { %605 = vmatprep.subr.bf16.mxu0 %v436_v33  ;;  %921 = vmatprep.subr.bf16.mxu1 %v436_v33  ;;  %v510_v51 = vmul.bf16 %v508_v41, %v485_v45  ;;  %v509_v54 = vmul.bf16 %v500_v49, %v480_v1  ;;  %v704_v49 = vld [vmem:[%s1460_s3] sm:$0xff] }
  0xc8   : > { %996 = vset.pattern.permute.xlu1 %v1138_v39  ;;  %997 = vset.pattern.permute.xlu0 %v1138_v39 }
  0xc9   : > { %v516_v46 = vpop.permute.xlu1 %515  ;;  %v514_v47 = vpop.permute.xlu0 %513 }
  0xca   : > { %606 = vmatpush1.bf16.msra.mxu0 %v435_v40  ;;  %930 = vmatpush1.bf16.msra.mxu1 %v435_v40  ;;  %v523_v53 = vsel %vm517_vm7, %v516_v46, %v514_v47  ;;  %v518_v56 = vsel %vm517_vm7, %v514_v47, %v516_v46 }
  0xcb   : > { %607 = vmatprep.subr.bf16.mxu0 %v472_v43  ;;  %922 = vmatprep.subr.bf16.mxu1 %v472_v43  ;;  %v546_v57 = vmul.bf16 %v544_v52, %v523_v53  ;;  %v545_v58 = vmul.bf16 %v537_v55, %v518_v56  ;;  %v706_v55 = vld [vmem:[%s1460_s3 + $0x10] sm:$0xff] }
  0xce   : > { %608 = vmatpush1.bf16.msra.mxu0 %v471_v48  ;;  %931 = vmatpush1.bf16.msra.mxu1 %v471_v48 }
  0xcf   : > { %609 = vmatprep.subr.bf16.mxu0 %v510_v51  ;;  %923 = vmatprep.subr.bf16.mxu1 %v510_v51 }
  0xd2   : > { %610 = vmatpush1.bf16.msra.mxu0 %v509_v54  ;;  %932 = vmatpush1.bf16.msra.mxu1 %v509_v54 }
  0xd3   : > { %611 = vmatprep.subr.bf16.mxu0 %v546_v57  ;;  %924 = vmatprep.subr.bf16.mxu1 %v546_v57 }
  0xd6   : > { %612 = vmatpush1.bf16.msra.mxu0 %v545_v58  ;;  %933 = vmatpush1.bf16.msra.mxu1 %v545_v58 }
  0xd9   : > { %628 = vmatmul.mubr.bf16.vlgmr.msra.gmra.mrb[0].mxu0 %v1017_v59  ;;  %638 = vmatmul.mubr.bf16.vlgmr.msra.gmra.mrb[0].mxu1 %v1020_v60  ;;  %v740_v59 = vld [vmem:[%s1461_s4] sm:$0xff]  ;;  %v741_v60 = vld [vmem:[%s1461_s4 + $0x8] sm:$0xff] }
 0x1ac   : > { %v629_v16 = vpop.f32.mrb[0].mxu0  ;;  %v639_v61 = vpop.f32.mrb[0].mxu1 }
 0x1ad   : > { %v631_v62 = vpop.f32.mrb[1].mxu0  ;;  %v641_v63 = vpop.f32.mrb[1].mxu1 }
 0x1ae   : > { %v633_v2 = vpop.f32.mrb[2].mxu0  ;;  %v643_v3 = vpop.f32.mrb[2].mxu1  ;;  %v648_v4 = vadd.f32 %v631_v62, %v629_v16  ;;  %v654_v5 = vadd.f32 %v641_v63, %v639_v61 }
 0x1af   : > { %v635_v6 = vpop.f32.mrb[3].mxu0  ;;  %v645_v7 = vpop.f32.mrb[3].mxu1 }
 0x1b0   : > { %v651_v9 = vadd.f32 %v635_v6, %v633_v2  ;;  %v657_v10 = vadd.f32 %v645_v7, %v643_v3  ;;  %649 = vadd.xlane.f32.xlu0 %v648_v4 }
 0x1b2   : > { %652 = vadd.xlane.f32.xlu1 %v651_v9 }
 0x1b4   : > { %655 = vadd.xlane.f32.xlu0 %v654_v5 }
 0x1b8   : > { %658 = vadd.xlane.f32.xlu0 %v657_v10 }
 0x23d   : > { %v650_v11 = vpop.xlane.xlu0 %649 }
 0x23e   : > { %v660_v12 = vmul.f32 0.00390625, %v650_v11 }
 0x23f   : > { %v653_v13 = vpop.xlane.xlu1 %652 }
 0x240   : > { %v1327_v14 = vsub.f32 %v629_v16, %v660_v12  ;;  %v1329_v15 = vsub.f32 %v631_v62, %v660_v12  ;;  %v661_v17 = vmul.f32 0.00390625, %v653_v13  ;;  %v742_v16 = vld [vmem:[%s1461_s4 + $0x10] sm:$0xff]  ;;  %v707_v62 = vld [vmem:[%s1460_s3 + $0x18] sm:$0xff] }
 0x241   : > { %v656_v18 = vpop.xlane.xlu0 %655 }
 0x242   : > { %v1331_v19 = vsub.f32 %v633_v2, %v661_v17  ;;  %v1333_v20 = vsub.f32 %v635_v6, %v661_v17  ;;  %v662_v21 = vmul.f32 0.00390625, %v656_v18  ;;  %v672_v22 = vmul.f32 %v1327_v14, %v1327_v14  ;;  %v743_v2 = vld [vmem:[%s1461_s4 + $0x18] sm:$0xff] }
 0x243   : > { %v673_v23 = vmul.f32 %v1329_v15, %v1329_v15 }
 0x244   : > { %v1339_v24 = vsub.f32 %v639_v61, %v662_v21  ;;  %v1341_v25 = vsub.f32 %v641_v63, %v662_v21  ;;  %v674_v26 = vmul.f32 %v1331_v19, %v1331_v19  ;;  %v675_v27 = vmul.f32 %v1333_v20, %v1333_v20 }
 0x245   : > { %v659_v28 = vpop.xlane.xlu0 %658  ;;  %v680_v29 = vadd.f32 %v673_v23, %v672_v22 }
 0x246   : > { %v663_v30 = vmul.f32 0.00390625, %v659_v28  ;;  %v683_v31 = vadd.f32 %v675_v27, %v674_v26  ;;  %v676_v32 = vmul.f32 %v1339_v24, %v1339_v24  ;;  %v677_v8 = vmul.f32 %v1341_v25, %v1341_v25 }
 0x247   : > { %681 = vadd.xlane.f32.xlu1 %v680_v29 }
 0x248   : > { %v1351_v33 = vsub.f32 %v643_v3, %v663_v30  ;;  %v1353_v34 = vsub.f32 %v645_v7, %v663_v30  ;;  %684 = vadd.xlane.f32.xlu0 %v683_v31  ;;  %v686_v35 = vadd.f32 %v677_v8, %v676_v32 }
 0x24a   : > { %v678_v36 = vmul.f32 %v1351_v33, %v1351_v33  ;;  %v679_v37 = vmul.f32 %v1353_v34, %v1353_v34 }
 0x24b   : > { %687 = vadd.xlane.f32.xlu1 %v686_v35 }
 0x24c   : > { %v689_v38 = vadd.f32 %v679_v37, %v678_v36 }
 0x24e   : > { %690 = vadd.xlane.f32.xlu0 %v689_v38 }
 0x2d4   : > { %v682_v40 = vpop.xlane.xlu1 %681 }
 0x2d5   : > { %v692_v41 = vmul.f32 0.00390625, %v682_v40  ;;  %v685_v42 = vpop.xlane.xlu0 %684 }
 0x2d6   : > { %v693_v0 = vmul.f32 0.00390625, %v685_v42 }
 0x2d7   : > { %v696_v43 = vadd.f32 1e-05, %v692_v41 }
 0x2d8   : > { %v697_v44 = vadd.f32 1e-05, %v693_v0  ;;  %v688_v45 = vpop.xlane.xlu1 %687 }
 0x2d9   : > { %1023 = vrsqrt.f32 %v696_v43  ;;  %v694_v46 = vmul.f32 0.00390625, %v688_v45 }
 0x2da   : > { %1025 = vrsqrt.f32 %v697_v44 }
 0x2db   : > { %v698_v47 = vadd.f32 1e-05, %v694_v46  ;;  %v691_v48 = vpop.xlane.xlu0 %690 }
 0x2dc   : > { %v695_v51 = vmul.f32 0.00390625, %v691_v48 }
 0x2dd   : > { %1027 = vrsqrt.f32 %v698_v47 }
 0x2de   : > { %v699_v57 = vadd.f32 1e-05, %v695_v51 }
 0x2e0   : > { %1029 = vrsqrt.f32 %v699_v57 }
 0x2e3   : > { %v1024_v1 = vpop.eup %1023 }
 0x2e4   : > { %v1026_v52 = vpop.eup %1025  ;;  %v708_v53 = vmul.f32 %v1024_v1, %v704_v49 }
 0x2e5   : > { %v709_v54 = vmul.f32 %v1026_v52, %v705_v50 }
 0x2e6   : > { %714 = vperm.xlu1 %996, %v708_v53  }
 0x2e7   : > { %v1028_v56 = vpop.eup %1027  ;;  %719 = vperm.xlu0 %997, %v709_v54  }
 0x2e8   : > { %v710_v58 = vmul.f32 %v1028_v56, %v706_v55 }
 0x2ea   : > { %724 = vperm.xlu1 %996, %v710_v58   ;;  %v1030_v61 = vpop.eup %1029 }
 0x2eb   : > { %v711_v63 = vmul.f32 %v1030_v61, %v707_v62 }
 0x2ee   : > { %746 = vperm.xlu1 %996, %v740_v59  }
 0x2f2   : > { %751 = vperm.xlu1 %996, %v741_v60  }
 0x2f6   : > { %756 = vperm.xlu1 %996, %v742_v16  }
 0x2fa   : > { %729 = vperm.xlu1 %996, %v711_v63  }
 0x2fe   : > { %761 = vperm.xlu1 %996, %v743_v2  }
 0x365   : > { %v715_v3 = vpop.permute.xlu1 %714 }
 0x366   : > { %v732_v5 = vmul.f32 %v715_v3, %v1327_v14  ;;  %v733_v6 = vmul.f32 %v715_v3, %v1329_v15  ;;  %v720_v7 = vpop.permute.xlu0 %719 }
 0x367   : > { %v734_v12 = vmul.f32 %v720_v7, %v1331_v19  ;;  %v735_v13 = vmul.f32 %v720_v7, %v1333_v20 }
 0x369   : > { %v725_v4 = vpop.permute.xlu1 %724 }
 0x36a   : > { %v736_v19 = vmul.f32 %v725_v4, %v1339_v24  ;;  %v737_v20 = vmul.f32 %v725_v4, %v1341_v25 }
 0x36d   : > { %v747_v9 = vpop.permute.xlu1 %746 }
 0x36e   : > { %v764_v10 = vadd.f32 %v747_v9, %v732_v5  ;;  %v765_v11 = vadd.f32 %v747_v9, %v733_v6 }
 0x370   : > { %v772_v17 = vmax.f32 %v764_v10, 0.0  ;;  %v773_v18 = vmax.f32 %v765_v11, 0.0 }
 0x371   : > { %v752_v21 = vpop.permute.xlu1 %751 }
 0x372   : > { %780 = vst [vmem:[%s1390_s14] sm:$0xff] %v772_v17  ;;  %781 = vst [vmem:[%s1390_s14 + $0x8] sm:$0xff] %v773_v18  ;;  %v766_v14 = vadd.f32 %v752_v21, %v734_v12  ;;  %v767_v15 = vadd.f32 %v752_v21, %v735_v13 }
 0x374   : > { %v774_v22 = vmax.f32 %v766_v14, 0.0  ;;  %v775_v23 = vmax.f32 %v767_v15, 0.0 }
 0x375   : > { %v757_v26 = vpop.permute.xlu1 %756 }
 0x376   : > { %782 = vst [vmem:[%s1390_s14 + $0x10] sm:$0xff] %v774_v22  ;;  %783 = vst [vmem:[%s1390_s14 + $0x18] sm:$0xff] %v775_v23  ;;  %v768_v27 = vadd.f32 %v757_v26, %v736_v19  ;;  %v769_v28 = vadd.f32 %v757_v26, %v737_v20 }
 0x378   : > { %v776_v29 = vmax.f32 %v768_v27, 0.0  ;;  %v777_v30 = vmax.f32 %v769_v28, 0.0 }
 0x379   : > { %v730_v31 = vpop.permute.xlu1 %729 }
 0x37a   : > { %784 = vst [vmem:[%s1390_s14 + $0x20] sm:$0xff] %v776_v29  ;;  %785 = vst [vmem:[%s1390_s14 + $0x28] sm:$0xff] %v777_v30  ;;  %v738_v24 = vmul.f32 %v730_v31, %v1351_v33  ;;  %v739_v25 = vmul.f32 %v730_v31, %v1353_v34 }
 0x37d   : > { %v762_v32 = vpop.permute.xlu1 %761 }
 0x37e   : > { %v770_v8 = vadd.f32 %v762_v32, %v738_v24  ;;  %v771_v35 = vadd.f32 %v762_v32, %v739_v25 }
 0x380   : > { %v778_v36 = vmax.f32 %v770_v8, 0.0  ;;  %v779_v37 = vmax.f32 %v771_v35, 0.0 }
 0x382   : > { %786 = vst [vmem:[%s1390_s14 + $0x30] sm:$0xff] %v778_v36  ;;  %787 = vst [vmem:[%s1390_s14 + $0x38] sm:$0xff] %v779_v37 }
 0x383   : > { %1072 = shalt.err (!%p1069_p7)
}
 0x384   : > { %s1073_s8 = scalar_lea.hbm %s1409_s25, 1024  ;;  %s1077_s12 = scalar_lea.hbm %s1462_s5, 2048 }
 0x385   : > { %p1074_p8 = scmp.ne.s32.totalorder %s1409_s25, %s1073_s8  ;;  %p1078_p1 = scmp.lt.u32.totalorder %s1409_s25, %s1462_s5 }
 0x386   : > { %p1079_p0 = scmp.lt.u32.totalorder %s1077_s12, %s1073_s8  ;;  %p1081_p6 = scmp.lt.u32.totalorder %s1073_s8, %s1409_s25 }
 0x387   : > { %p1075_p11 = pnand %p1074_p8, %p1473_p9 }
 0x388   : > { %p1080_p5 = por %p1079_p0, %p1078_p1 }
 0x389   : > { %p1076_p13 = pneg %p1075_p11 }
 0x38a   : > { %p1082_p10 = por %p1081_p6, %p1080_p5 }
 0x38c   : > { %p1083_p12 = pnand %p1082_p10, %p1076_p13 }
 0x38e   : > { %1086 = shalt.err (!%p1083_p12)
}
 0x38f   : > { %s1140_s16 = smov 256  }
 0x390   : > { %938 = dma.vmem_to_hbm [thread:$0]  (%p1473_p9), %s1404_s15, 1024, %s1409_s25, %s1415_s26, %s1140_s16, %s1140_s16, %s1130_s7  }
 0x391 PF: > { %p950_p2 = scmp.ge.s32.totalorder %s1125_s21, 2  ;;  %s817_s17 = sand.u32 1, %s1113_s18  }
 0x392   : > { %p1474_p3 = scmp.ne.s32.totalorder %s1467_s29, 0  ;;  %s818_s23 = scalar_lea.sflag [#allocation5], %s817_s17 }
 0x394   : > { %p945_p4 = pnand %p950_p2, %p1474_p3 }
 0x396   : > { %1108 = dma.done.wait (!%p945_p4), %s818_s23, 1024  }
 0x397   : > { %1110 = vsyncadd (!%p945_p4), %s818_s23, 4294966272  ;;  %p16_p7 = scmp.ge.s32.totalorder %s1196_s24, 4   ;;  %s1475_s18 = smov %s1117_s19 }
 0x398   : > { %s1476_s19 = smov %s1121_s20  ;;  %s1477_s20 = smov %s1207_s27 }
 0x399   : > { %s1478_s21 = smov %s1196_s24  ;;  %18 = sbr.rel (!%p16_p7) target bundleno = 4 (0x4), region = 80 }
 0x3a0   :  { %823 = vsyncpa [#allocation4], 1 }
 0x3a1   :  { %825 = vsyncpa [#allocation4 + $0x1], 1 }
 0x3a2   :  { %826 = vsyncpa [#allocation5], 1 }
 0x3a3   :  { %828 = vsyncpa [#allocation5 + $0x1], 1 }

</bundles_post_ra>
